<compile_context>
chip_gen: v7x
topology: tpu7x:2x2x1
jax: 0.10.0
libtpu: 0.0.40
codegen_flags: <defaults>
</compile_context>

<pallas_src>
import math
import numpy as np
import jax
import jax.numpy as jnp
from jax.experimental import pallas as pl
from jax.experimental.pallas import tpu as pltpu

BN_EPS = 1e-5
BN_SCALE = 1.0 / math.sqrt(1.0 + BN_EPS)   # eval BatchNorm1d with init stats
LEAKY_SLOPE = 0.2

HIDDEN = 32                       # hidden_channels (encoder output width)
NUM_CELLS = 8                     # self.index
NUM_DRUGS = 4
NUM_NODES = NUM_CELLS + NUM_DRUGS
NUM_PAIRS = NUM_CELLS * NUM_DRUGS
ATOMS_PER_DRUG = 5
NUM_ATOMS = NUM_DRUGS * ATOMS_PER_DRUG
ATOM_DIM = 16
MUT_DIM, GEX_DIM, METH_DIM = 16, 12, 8
OMICS_DIM = MUT_DIM + GEX_DIM + METH_DIM   # 36
FEAT_DIM = 100                    # feat() output width / fc,fd input width
LANES = 128                       # lane-dense padded width

# ----- activations slab layout (rows of a (64,128) f32 array) ---------------
ACT_ROWS = 64
ATOM_PAD = 24                     # 20 atoms padded to a multiple of 8
A_OMICS_R = 0                     # rows  0:8   cols 0:36            omics
A_AX_R = 8                        # rows  8:28  cols 36:52           atom_adj@X
A_POOL_R = 32                     # rows 32:36  cols 0:20            pool matrix
A_ADJ_R = 40                      # rows 40:64  cols 0:12            [A_pos;A_neg]

# ----- weights slab layout (rows of a (840,128) f32 array) ------------------
OFF_FEAT = 0      # (128,128) rows 0:36 = W_om (out cols 0:100); rows 36:52 = W_atom
OFF_ENC = 128     # (128,128) rows 0:100 = W_enc (out cols 0:32)
OFF_MLP1 = 256    # (128,128) rows 0:100; cols 0:64 = fc_W1, 64:128 = fd_W1
OFF_MLP2 = 384    # (128,128) rows 0:64 cols 0:32 = s*fc_W2; rows 64:128 cols 32:64 = s*fd_W2
OFF_U = 512       # (128,128) rows 0:32: cols 0:32 = W1[cellpos], cols 32:64 = W1[drugpos]
OFF_V = 640       # (128,128) rows 0:32 cols 0:32 = W1[cellfea]; rows 32:64 cols 32:64 = W1[drugfea]
OFF_P2 = 768      # (32,128)  col 0 = s*pr_W2
OFF_BIAS = 800    # (8,128)   row0 b_om, row1 b_mlp1, row2 b_mlp2, row3 pr_b1, row4 pr_b2
OFF_E = 808       # (32,128)  cols 0:12 = pair-expansion two-hot constant
W_ROWS = 840

# ----- output slab layout (rows of a (64,128) f32 array) --------------------
OUT_ROWS = 64
O_Z = 0           # rows  0:12 pos_z, 12:24 neg_z          (cols 0:32 real)
O_SUM = 24        # row 24 = summary_pos, row 25 = summary_neg
O_ADJ = 32        # rows 32:64, col 0 = flat pos_adj (pair-major = cell*Nd+drug)


def _leaky(x):
    return jnp.where(x > 0, x, LEAKY_SLOPE * x)


# ----------------------------------------------------------------------------
# The single fused forward kernel.  2 inputs, 1 output, everything in VMEM.
# ----------------------------------------------------------------------------
def _fused_graphcdr_kernel(acts_ref, w_ref, out_ref):
    f32 = jnp.float32

    def dot(a, b):
        return jnp.dot(a, b, preferred_element_type=f32)

    bias = w_ref[OFF_BIAS:OFF_BIAS + 8, :]                      # (8,128)
    b_om = bias[0:1, :]
    b_mlp1 = bias[1:2, :]
    b_mlp2 = bias[2:3, :]
    b_pr1 = bias[3:4, 0:HIDDEN]                                 # (1,32)
    b_pr2 = bias[4:5, :]

    # ---- feat(): omics->cell and atoms->drug in ONE fused matmul ------------
    featin = acts_ref[0:A_POOL_R, :]                            # (32,128)
    r = dot(featin, w_ref[OFF_FEAT:OFF_FEAT + 128, :])          # (32,128)
    cell_feat = _leaky(r[0:NUM_CELLS, :] + b_om)                # (8,128)
    atom_h = jnp.maximum(r[A_AX_R:A_AX_R + ATOM_PAD, :], 0.0)   # (24,128)
    pool = acts_ref[A_POOL_R:A_POOL_R + 8, :][0:NUM_DRUGS, 0:ATOM_PAD]   # (4,24)
    drug_feat = dot(pool, atom_h)                               # (4,128)
    feature = jnp.concatenate([cell_feat, drug_feat], axis=0)   # (12,128)

    # ---- encoder GCN on stacked pos/neg graphs: relu([Apos;Aneg] @ X @ W) ---
    xw = dot(feature, w_ref[OFF_ENC:OFF_ENC + 128, :])          # (12,128)
    a_both = acts_ref[A_ADJ_R:A_ADJ_R + 2 * NUM_NODES, :][:, 0:NUM_NODES]  # (24,12)
    z_both = jnp.maximum(dot(a_both, xw), 0.0)                  # (24,128)
    pos_z = z_both[0:NUM_NODES, :]
    neg_z = z_both[NUM_NODES:2 * NUM_NODES, :]
    out_ref[0:2 * NUM_NODES, :] = z_both                        # rows 0:24
    # F.dropout(..., training=False) -> identity (eval mode)

    # ---- summaries: DGI-style sigmoid of mean node embedding (XLU reduce) ---
    spos = jax.nn.sigmoid(jnp.mean(pos_z, axis=0, keepdims=True))   # (1,128)
    sneg = jax.nn.sigmoid(jnp.mean(neg_z, axis=0, keepdims=True))
    out_ref[O_SUM:O_SUM + 8, :] = jnp.concatenate(
        [spos, sneg, jnp.zeros((6, LANES), f32)], axis=0)

    # ---- merged fc / fd MLPs (BN scale folded into W2 at init) --------------
    h1 = _leaky(dot(feature, w_ref[OFF_MLP1:OFF_MLP1 + 128, :]) + b_mlp1)    # (12,128)
    mlpout = _leaky(dot(h1, w_ref[OFF_MLP2:OFF_MLP2 + 128, :]) + b_mlp2)     # (12,128)
    # cellfea = mlpout[0:8, 0:32] ; drugfea = mlpout[8:12, 32:64]

    # ---- pairwise predictor --------------------------------------------------
    # comb[cell c, 0:32]  = cellpos_c@W1cp + cellfea_c@W1cf = hc[c]
    # comb[drug d, 32:64] = drugpos_d@W1dp + drugfea_d@W1df = hd[d]
    comb = (dot(pos_z, w_ref[OFF_U:OFF_U + 128, :])
            + dot(mlpout, w_ref[OFF_V:OFF_V + 128, :]))          # (12,128)
    hc = comb[0:NUM_CELLS, 0:HIDDEN]                             # (8,32)
    hd = comb[NUM_CELLS:NUM_NODES, HIDDEN:2 * HIDDEN]            # (4,32)
    hcd = jnp.concatenate([hc, hd], axis=0)                      # (12,32)

    # pair expansion with the precomputed two-hot constant: h[p] = hc[c] + hd[d]
    e = w_ref[OFF_E:OFF_E + NUM_PAIRS, :][:, 0:NUM_NODES]        # (32,12)
    h = _leaky(dot(e, hcd) + b_pr1)                              # (32,32)
    logits = dot(h, w_ref[OFF_P2:OFF_P2 + HIDDEN, :]) + b_pr2    # (32,128) lane-dense
    out_ref[O_ADJ:O_ADJ + NUM_PAIRS, :] = jax.nn.sigmoid(logits)  # col 0 is real adj


# ----------------------------------------------------------------------------
# Parameters: deterministic Xavier-uniform init, zero biases, everything packed
# into one (840,128) slab with static row offsets (done ONCE here).
# ----------------------------------------------------------------------------
def xavier(key, shape):
    bound = math.sqrt(6.0 / (shape[0] + shape[1]))
    return jax.random.uniform(key, shape, jnp.float32, -bound, bound)


def init_params(key):
    ks = jax.random.split(key, 12)
    w_om = np.asarray(xavier(ks[0], (OMICS_DIM, FEAT_DIM)))
    w_atom = np.asarray(xavier(ks[1], (ATOM_DIM, FEAT_DIM)))
    w_enc = np.asarray(xavier(ks[2], (FEAT_DIM, HIDDEN)))
    fc_w1 = np.asarray(xavier(ks[3], (FEAT_DIM, 64)))
    fc_w2 = np.asarray(xavier(ks[4], (64, 32)))
    fd_w1 = np.asarray(xavier(ks[5], (FEAT_DIM, 64)))
    fd_w2 = np.asarray(xavier(ks[6], (64, 32)))
    # TODO(synk): predictor Linear(64,32) widened to 128 inputs (see header note).
    pr_w1 = np.asarray(xavier(ks[7], (2 * (HIDDEN + 32), 32)))
    pr_w2 = np.asarray(xavier(ks[8], (32, 1)))

    W = np.zeros((W_ROWS, LANES), np.float32)
    # feat(): fused omics/atom weight block
    W[OFF_FEAT:OFF_FEAT + OMICS_DIM, 0:FEAT_DIM] = w_om
    W[OFF_FEAT + OMICS_DIM:OFF_FEAT + OMICS_DIM + ATOM_DIM, 0:FEAT_DIM] = w_atom
    # encoder
    W[OFF_ENC:OFF_ENC + FEAT_DIM, 0:HIDDEN] = w_enc
    # merged fc|fd first layer
    W[OFF_MLP1:OFF_MLP1 + FEAT_DIM, 0:64] = fc_w1
    W[OFF_MLP1:OFF_MLP1 + FEAT_DIM, 64:128] = fd_w1
    # merged block-diagonal second layer with eval-BN scale folded in
    W[OFF_MLP2:OFF_MLP2 + 64, 0:32] = BN_SCALE * fc_w2
    W[OFF_MLP2 + 64:OFF_MLP2 + 128, 32:64] = BN_SCALE * fd_w2
    # predictor layer-1, split into pos_z path (U) and feature path (V)
    W[OFF_U:OFF_U + HIDDEN, 0:32] = pr_w1[0:32]          # cellpos block
    W[OFF_U:OFF_U + HIDDEN, 32:64] = pr_w1[64:96]        # drugpos block
    W[OFF_V:OFF_V + 32, 0:32] = pr_w1[32:64]             # cellfea block
    W[OFF_V + 32:OFF_V + 64, 32:64] = pr_w1[96:128]      # drugfea block
    # predictor layer-2 (BN folded), lane-dense with real weight in col 0
    W[OFF_P2:OFF_P2 + 32, 0:1] = BN_SCALE * pr_w2
    # biases (rows OFF_BIAS..OFF_BIAS+4) stay zero (reference zero-inits them)
    # pair-expansion two-hot constant: e[p, c]=1, e[p, 8+d]=1 for p = c*Nd + d
    for p in range(NUM_PAIRS):
        W[OFF_E + p, p // NUM_DRUGS] = 1.0
        W[OFF_E + p, NUM_CELLS + (p % NUM_DRUGS)] = 1.0

    return {
        "slab": jnp.asarray(W),
        # discriminator weights from __init__ (unused in forward)
        "weight": xavier(ks[9], (HIDDEN, HIDDEN)),
        "weight2": xavier(ks[10], (HIDDEN, HIDDEN)),
    }


# ----------------------------------------------------------------------------
# JIT-ed core: tiny glue ops + the single fused Pallas kernel.
# ----------------------------------------------------------------------------
@jax.jit
def graphcdr_core(weight_slab, drug_feature, drug_adj, ibatch,
                  mutation_data, gexpr_data, methylation_data, a_pos, a_neg):
    f32 = jnp.float32

    omics = jnp.concatenate([mutation_data, gexpr_data, methylation_data], axis=1)

    # row-normalised atom adjacency with self loops, then ax = A_atom @ X
    a = drug_adj + jnp.eye(NUM_ATOMS, dtype=f32)
    atom_adj = a / jnp.maximum(jnp.sum(a, axis=1, keepdims=True), 1.0)
    ax = atom_adj @ drug_feature                                  # (20,16)

    # mean-pooling matrix from ibatch (zero-atom safe)
    onehot = jax.nn.one_hot(ibatch, NUM_DRUGS, dtype=f32)         # (A, Nd)
    counts = jnp.maximum(jnp.sum(onehot, axis=0, keepdims=True), 1.0)
    pool = (onehot / counts).T                                    # (Nd, A)

    # pack all activation-side operands into one lane-dense slab
    acts = jnp.zeros((ACT_ROWS, LANES), f32)
    acts = acts.at[A_OMICS_R:A_OMICS_R + NUM_CELLS, 0:OMICS_DIM].set(omics)
    acts = acts.at[A_AX_R:A_AX_R + NUM_ATOMS,
                   OMICS_DIM:OMICS_DIM + ATOM_DIM].set(ax)
    acts = acts.at[A_POOL_R:A_POOL_R + NUM_DRUGS, 0:NUM_ATOMS].set(pool)
    acts = acts.at[A_ADJ_R:A_ADJ_R + NUM_NODES, 0:NUM_NODES].set(a_pos)
    acts = acts.at[A_ADJ_R + NUM_NODES:A_ADJ_R + 2 * NUM_NODES,
                   0:NUM_NODES].set(a_neg)

    out = pl.pallas_call(
        _fused_graphcdr_kernel,
        out_shape=jax.ShapeDtypeStruct((OUT_ROWS, LANES), f32),
        in_specs=[pl.BlockSpec(memory_space=pltpu.MemorySpace.VMEM),
                  pl.BlockSpec(memory_space=pltpu.MemorySpace.VMEM)],
        out_specs=pl.BlockSpec(memory_space=pltpu.MemorySpace.VMEM),
    )(acts, weight_slab)

    pos_z = out[0:NUM_NODES, 0:HIDDEN]
    neg_z = out[NUM_NODES:2 * NUM_NODES, 0:HIDDEN]
    summary_pos = out[O_SUM, 0:HIDDEN]
    summary_neg = out[O_SUM + 1, 0:HIDDEN]
    pos_adj = out[O_ADJ:O_ADJ + NUM_PAIRS, 0]
    return pos_z, neg_z, summary_pos, summary_neg, pos_adj


# ----------------------------------------------------------------------------
# Host-side edge handling (mirrors the torch.from_numpy path), then jit core.
# ----------------------------------------------------------------------------
def _row_norm_adj_np(src, dst, n):
    a = np.zeros((n, n), np.float32)
    a[src, dst] = 1.0
    a[dst, src] = 1.0
    a += np.eye(n, dtype=np.float32)
    deg = a.sum(axis=1, keepdims=True)
    return a / np.maximum(deg, 1.0)


def graphcdr_forward(params, drug_feature, drug_adj, ibatch,
                     mutation_data, gexpr_data, methylation_data, edge):
    num_nodes = NUM_NODES            # == feature.shape[0] of the synthetic feat()

    pos_edge = edge[edge[:, 2] == 1, 0:2].T
    neg_edge = edge[edge[:, 2] == -1, 0:2].T
    pos_edge = pos_edge[:, (pos_edge[0] < num_nodes) & (pos_edge[1] < num_nodes)]
    neg_edge = neg_edge[:, (neg_edge[0] < num_nodes) & (neg_edge[1] < num_nodes)]
    if pos_edge.size == 0:
        pos_edge = np.stack([np.arange(num_nodes), np.arange(num_nodes)])
    if neg_edge.size == 0:
        neg_edge = np.stack([np.arange(num_nodes), np.arange(num_nodes)])

    a_pos = jnp.asarray(_row_norm_adj_np(pos_edge[0], pos_edge[1], num_nodes))
    a_neg = jnp.asarray(_row_norm_adj_np(neg_edge[0], neg_edge[1], num_nodes))

    return graphcdr_core(params["slab"], drug_feature, drug_adj, ibatch,
                         mutation_data, gexpr_data, methylation_data,
                         a_pos, a_neg)


# ----------------------------------------------------------------------------
# main
# ----------------------------------------------------------------------------
if __name__ == "__main__":
    key = jax.random.PRNGKey(0)
    k_in, k_param = jax.random.split(key)
    ki = jax.random.split(k_in, 6)

    params = init_params(k_param)

    # inputs
    drug_feature = jax.random.normal(ki[0], (NUM_ATOMS, ATOM_DIM), jnp.float32)
    mutation_data = jax.random.normal(ki[1], (NUM_CELLS, MUT_DIM), jnp.float32)
    gexpr_data = jax.random.normal(ki[2], (NUM_CELLS, GEX_DIM), jnp.float32)
    methylation_data = jax.random.normal(ki[3], (NUM_CELLS, METH_DIM), jnp.float32)

    # per-drug chain adjacency over atoms (deterministic)
    drug_adj_np = np.zeros((NUM_ATOMS, NUM_ATOMS), np.float32)
    for d in range(NUM_DRUGS):
        for a in range(ATOMS_PER_DRUG - 1):
            i = d * ATOMS_PER_DRUG + a
            drug_adj_np[i, i + 1] = 1.0
            drug_adj_np[i + 1, i] = 1.0
    drug_adj = jnp.asarray(drug_adj_np)
    ibatch = jnp.asarray(np.repeat(np.arange(NUM_DRUGS), ATOMS_PER_DRUG), jnp.int32)

    # labelled cell-drug edge list (last column = +1 / -1), plus one
    # out-of-range edge to exercise the validity mask.
    edges = []
    for c in range(NUM_CELLS):
        for d in range(NUM_DRUGS):
            edges.append([c, NUM_CELLS + d, 1 if (c + d) % 2 == 0 else -1])
    edges.append([0, 99, 1])
    edge = np.asarray(edges, dtype=np.int64)

    outs = graphcdr_forward(params, drug_feature, drug_adj, ibatch,
                            mutation_data, gexpr_data, methylation_data, edge)
    outs = jax.block_until_ready(outs)

    pos_z, neg_z, summary_pos, summary_neg, pos_adj_flat = outs
    assert pos_z.shape == (NUM_NODES, HIDDEN)
    assert neg_z.shape == (NUM_NODES, HIDDEN)
    assert summary_pos.shape == (HIDDEN,)
    assert summary_neg.shape == (HIDDEN,)
    assert pos_adj_flat.shape == (NUM_CELLS * NUM_DRUGS,)
    assert bool(jnp.all(jnp.isfinite(pos_adj_flat)))
    assert bool(jnp.all(jnp.isfinite(pos_z))) and bool(jnp.all(jnp.isfinite(neg_z)))
    assert bool(jnp.all(jnp.isfinite(summary_pos))) and bool(jnp.all(jnp.isfinite(summary_neg)))
    print("KERNEL_OK")
</pallas_src>

<mosaic_0001>
module attributes {stable_mosaic.version = 11 : i64} {
  func.func @_fused_graphcdr_kernel(%arg0: memref<64x128xf32, #tpu.memory_space<vmem>>, %arg1: memref<840x128xf32, #tpu.memory_space<vmem>>, %arg2: memref<64x128xf32, #tpu.memory_space<vmem>>) attributes {dimension_semantics = [], scalar_prefetch = 0 : i64, scratch_operands = 0 : i64, tpu.core_type = #tpu.core_type<tc>} {
    %c800 = arith.constant 800 : index
    %c0 = arith.constant 0 : index
    %0 = vector.load %arg1[%c800, %c0] : memref<840x128xf32, #tpu.memory_space<vmem>>, vector<8x128xf32>
    %1 = vector.extract_strided_slice %0 {offsets = [0, 0], sizes = [1, 128], strides = [1, 1]} : vector<8x128xf32> to vector<1x128xf32>
    %2 = vector.extract_strided_slice %0 {offsets = [1, 0], sizes = [1, 128], strides = [1, 1]} : vector<8x128xf32> to vector<1x128xf32>
    %3 = vector.extract_strided_slice %0 {offsets = [2, 0], sizes = [1, 128], strides = [1, 1]} : vector<8x128xf32> to vector<1x128xf32>
    %4 = vector.extract_strided_slice %0 {offsets = [3, 0], sizes = [1, 32], strides = [1, 1]} : vector<8x128xf32> to vector<1x32xf32>
    %5 = vector.extract_strided_slice %0 {offsets = [4, 0], sizes = [1, 128], strides = [1, 1]} : vector<8x128xf32> to vector<1x128xf32>
    %c0_0 = arith.constant 0 : index
    %c0_1 = arith.constant 0 : index
    %6 = vector.load %arg0[%c0_0, %c0_1] : memref<64x128xf32, #tpu.memory_space<vmem>>, vector<32x128xf32>
    %c0_2 = arith.constant 0 : index
    %c0_3 = arith.constant 0 : index
    %7 = vector.load %arg1[%c0_2, %c0_3] : memref<840x128xf32, #tpu.memory_space<vmem>>, vector<128x128xf32>
    %cst = arith.constant dense<0.000000e+00> : vector<32x128xf32>
    %8 = tpu.matmul %6, %7, %cst {dimension_numbers = #tpu.dot_dimension_numbers<[1], [0], [0], [1], [0, 0, 1, 1], [], []>} : vector<32x128xf32>, vector<128x128xf32>, vector<32x128xf32> -> vector<32x128xf32>
    %9 = vector.extract_strided_slice %8 {offsets = [0, 0], sizes = [8, 128], strides = [1, 1]} : vector<32x128xf32> to vector<8x128xf32>
    %10 = vector.broadcast %1 : vector<1x128xf32> to vector<8x128xf32>
    %11 = arith.addf %9, %10 : vector<8x128xf32>
    %cst_4 = arith.constant 0.000000e+00 : f32
    %12 = vector.broadcast %cst_4 : f32 to vector<8x128xf32>
    %13 = arith.cmpf ogt, %11, %12 : vector<8x128xf32>
    %cst_5 = arith.constant 2.000000e-01 : f32
    %14 = vector.broadcast %cst_5 : f32 to vector<8x128xf32>
    %15 = arith.mulf %14, %11 : vector<8x128xf32>
    %16 = arith.select %13, %11, %15 : vector<8x128xi1>, vector<8x128xf32>
    %17 = vector.extract_strided_slice %8 {offsets = [8, 0], sizes = [24, 128], strides = [1, 1]} : vector<32x128xf32> to vector<24x128xf32>
    %cst_6 = arith.constant 0.000000e+00 : f32
    %18 = vector.broadcast %cst_6 : f32 to vector<24x128xf32>
    %19 = arith.maximumf %17, %18 : vector<24x128xf32>
    %c32 = arith.constant 32 : index
    %c0_7 = arith.constant 0 : index
    %20 = vector.load %arg0[%c32, %c0_7] : memref<64x128xf32, #tpu.memory_space<vmem>>, vector<8x128xf32>
    %21 = vector.extract_strided_slice %20 {offsets = [0, 0], sizes = [4, 24], strides = [1, 1]} : vector<8x128xf32> to vector<4x24xf32>
    %cst_8 = arith.constant dense<0.000000e+00> : vector<4x128xf32>
    %22 = tpu.matmul %21, %19, %cst_8 {dimension_numbers = #tpu.dot_dimension_numbers<[1], [0], [0], [1], [0, 0, 1, 1], [], []>} : vector<4x24xf32>, vector<24x128xf32>, vector<4x128xf32> -> vector<4x128xf32>
    %23 = tpu.concatenate %16, %22 in 0 : vector<8x128xf32>, vector<4x128xf32> -> vector<12x128xf32>
    %c128 = arith.constant 128 : index
    %c0_9 = arith.constant 0 : index
    %24 = vector.load %arg1[%c128, %c0_9] : memref<840x128xf32, #tpu.memory_space<vmem>>, vector<128x128xf32>
    %cst_10 = arith.constant dense<0.000000e+00> : vector<12x128xf32>
    %25 = tpu.matmul %23, %24, %cst_10 {dimension_numbers = #tpu.dot_dimension_numbers<[1], [0], [0], [1], [0, 0, 1, 1], [], []>} : vector<12x128xf32>, vector<128x128xf32>, vector<12x128xf32> -> vector<12x128xf32>
    %c40 = arith.constant 40 : index
    %c0_11 = arith.constant 0 : index
    %26 = vector.load %arg0[%c40, %c0_11] : memref<64x128xf32, #tpu.memory_space<vmem>>, vector<24x128xf32>
    %27 = vector.extract_strided_slice %26 {offsets = [0, 0], sizes = [24, 12], strides = [1, 1]} : vector<24x128xf32> to vector<24x12xf32>
    %cst_12 = arith.constant dense<0.000000e+00> : vector<24x128xf32>
    %28 = tpu.matmul %27, %25, %cst_12 {dimension_numbers = #tpu.dot_dimension_numbers<[1], [0], [0], [1], [0, 0, 1, 1], [], []>} : vector<24x12xf32>, vector<12x128xf32>, vector<24x128xf32> -> vector<24x128xf32>
    %cst_13 = arith.constant 0.000000e+00 : f32
    %29 = vector.broadcast %cst_13 : f32 to vector<24x128xf32>
    %30 = arith.maximumf %28, %29 : vector<24x128xf32>
    %31 = vector.extract_strided_slice %30 {offsets = [0, 0], sizes = [12, 128], strides = [1, 1]} : vector<24x128xf32> to vector<12x128xf32>
    %32 = vector.extract_strided_slice %30 {offsets = [12, 0], sizes = [12, 128], strides = [1, 1]} : vector<24x128xf32> to vector<12x128xf32>
    %c0_14 = arith.constant 0 : index
    %c0_15 = arith.constant 0 : index
    %33 = vector.load %arg2[%c0_14, %c0_15] : memref<64x128xf32, #tpu.memory_space<vmem>>, vector<24x128xf32>
    tpu.vector_store %arg2[%c0_14, %c0_15], %30 {strides = array<i32>} : memref<64x128xf32, #tpu.memory_space<vmem>>, vector<24x128xf32>,
    %cst_16 = arith.constant dense<0.000000e+00> : vector<128xf32>
    %34 = vector.multi_reduction <add>, %31, %cst_16 [0] : vector<12x128xf32> to vector<128xf32>
    %35 = vector.shape_cast %34 : vector<128xf32> to vector<1x128xf32>
    %cst_17 = arith.constant 1.200000e+01 : f32
    %36 = vector.broadcast %cst_17 : f32 to vector<1x128xf32>
    %37 = arith.divf %35, %36 : vector<1x128xf32>
    %38 = arith.negf %37 : vector<1x128xf32>
    %39 = math.exp %38 : vector<1x128xf32>
    %cst_18 = arith.constant 1.000000e+00 : f32
    %40 = vector.broadcast %cst_18 : f32 to vector<1x128xf32>
    %41 = arith.addf %40, %39 : vector<1x128xf32>
    %42 = arith.divf %40, %41 : vector<1x128xf32>
    %cst_19 = arith.constant dense<0.000000e+00> : vector<128xf32>
    %43 = vector.multi_reduction <add>, %32, %cst_19 [0] : vector<12x128xf32> to vector<128xf32>
    %44 = vector.shape_cast %43 : vector<128xf32> to vector<1x128xf32>
    %cst_20 = arith.constant 1.200000e+01 : f32
    %45 = vector.broadcast %cst_20 : f32 to vector<1x128xf32>
    %46 = arith.divf %44, %45 : vector<1x128xf32>
    %47 = arith.negf %46 : vector<1x128xf32>
    %48 = math.exp %47 : vector<1x128xf32>
    %cst_21 = arith.constant 1.000000e+00 : f32
    %49 = vector.broadcast %cst_21 : f32 to vector<1x128xf32>
    %50 = arith.addf %49, %48 : vector<1x128xf32>
    %51 = arith.divf %49, %50 : vector<1x128xf32>
    %cst_22 = arith.constant 0.000000e+00 : f32
    %52 = vector.broadcast %cst_22 : f32 to vector<6x128xf32>
    %53 = tpu.concatenate %42, %51, %52 in 0 : vector<1x128xf32>, vector<1x128xf32>, vector<6x128xf32> -> vector<8x128xf32>
    %c24 = arith.constant 24 : index
    %c0_23 = arith.constant 0 : index
    %54 = vector.load %arg2[%c24, %c0_23] : memref<64x128xf32, #tpu.memory_space<vmem>>, vector<8x128xf32>
    tpu.vector_store %arg2[%c24, %c0_23], %53 {strides = array<i32>} : memref<64x128xf32, #tpu.memory_space<vmem>>, vector<8x128xf32>,
    %c256 = arith.constant 256 : index
    %c0_24 = arith.constant 0 : index
    %55 = vector.load %arg1[%c256, %c0_24] : memref<840x128xf32, #tpu.memory_space<vmem>>, vector<128x128xf32>
    %cst_25 = arith.constant dense<0.000000e+00> : vector<12x128xf32>
    %56 = tpu.matmul %23, %55, %cst_25 {dimension_numbers = #tpu.dot_dimension_numbers<[1], [0], [0], [1], [0, 0, 1, 1], [], []>} : vector<12x128xf32>, vector<128x128xf32>, vector<12x128xf32> -> vector<12x128xf32>
    %57 = vector.broadcast %2 : vector<1x128xf32> to vector<12x128xf32>
    %58 = arith.addf %56, %57 : vector<12x128xf32>
    %cst_26 = arith.constant 0.000000e+00 : f32
    %59 = vector.broadcast %cst_26 : f32 to vector<12x128xf32>
    %60 = arith.cmpf ogt, %58, %59 : vector<12x128xf32>
    %cst_27 = arith.constant 2.000000e-01 : f32
    %61 = vector.broadcast %cst_27 : f32 to vector<12x128xf32>
    %62 = arith.mulf %61, %58 : vector<12x128xf32>
    %63 = arith.select %60, %58, %62 : vector<12x128xi1>, vector<12x128xf32>
    %c384 = arith.constant 384 : index
    %c0_28 = arith.constant 0 : index
    %64 = vector.load %arg1[%c384, %c0_28] : memref<840x128xf32, #tpu.memory_space<vmem>>, vector<128x128xf32>
    %cst_29 = arith.constant dense<0.000000e+00> : vector<12x128xf32>
    %65 = tpu.matmul %63, %64, %cst_29 {dimension_numbers = #tpu.dot_dimension_numbers<[1], [0], [0], [1], [0, 0, 1, 1], [], []>} : vector<12x128xf32>, vector<128x128xf32>, vector<12x128xf32> -> vector<12x128xf32>
    %66 = vector.broadcast %3 : vector<1x128xf32> to vector<12x128xf32>
    %67 = arith.addf %65, %66 : vector<12x128xf32>
    %cst_30 = arith.constant 0.000000e+00 : f32
    %68 = vector.broadcast %cst_30 : f32 to vector<12x128xf32>
    %69 = arith.cmpf ogt, %67, %68 : vector<12x128xf32>
    %cst_31 = arith.constant 2.000000e-01 : f32
    %70 = vector.broadcast %cst_31 : f32 to vector<12x128xf32>
    %71 = arith.mulf %70, %67 : vector<12x128xf32>
    %72 = arith.select %69, %67, %71 : vector<12x128xi1>, vector<12x128xf32>
    %c512 = arith.constant 512 : index
    %c0_32 = arith.constant 0 : index
    %73 = vector.load %arg1[%c512, %c0_32] : memref<840x128xf32, #tpu.memory_space<vmem>>, vector<128x128xf32>
    %cst_33 = arith.constant dense<0.000000e+00> : vector<12x128xf32>
    %74 = tpu.matmul %31, %73, %cst_33 {dimension_numbers = #tpu.dot_dimension_numbers<[1], [0], [0], [1], [0, 0, 1, 1], [], []>} : vector<12x128xf32>, vector<128x128xf32>, vector<12x128xf32> -> vector<12x128xf32>
    %c640 = arith.constant 640 : index
    %c0_34 = arith.constant 0 : index
    %75 = vector.load %arg1[%c640, %c0_34] : memref<840x128xf32, #tpu.memory_space<vmem>>, vector<128x128xf32>
    %cst_35 = arith.constant dense<0.000000e+00> : vector<12x128xf32>
    %76 = tpu.matmul %72, %75, %cst_35 {dimension_numbers = #tpu.dot_dimension_numbers<[1], [0], [0], [1], [0, 0, 1, 1], [], []>} : vector<12x128xf32>, vector<128x128xf32>, vector<12x128xf32> -> vector<12x128xf32>
    %77 = arith.addf %74, %76 : vector<12x128xf32>
    %78 = vector.extract_strided_slice %77 {offsets = [0, 0], sizes = [8, 32], strides = [1, 1]} : vector<12x128xf32> to vector<8x32xf32>
    %79 = vector.extract_strided_slice %77 {offsets = [8, 32], sizes = [4, 32], strides = [1, 1]} : vector<12x128xf32> to vector<4x32xf32>
    %80 = tpu.concatenate %78, %79 in 0 : vector<8x32xf32>, vector<4x32xf32> -> vector<12x32xf32>
    %c808 = arith.constant 808 : index
    %c0_36 = arith.constant 0 : index
    %81 = vector.load %arg1[%c808, %c0_36] : memref<840x128xf32, #tpu.memory_space<vmem>>, vector<32x128xf32>
    %82 = vector.extract_strided_slice %81 {offsets = [0, 0], sizes = [32, 12], strides = [1, 1]} : vector<32x128xf32> to vector<32x12xf32>
    %cst_37 = arith.constant dense<0.000000e+00> : vector<32x32xf32>
    %83 = tpu.matmul %82, %80, %cst_37 {dimension_numbers = #tpu.dot_dimension_numbers<[1], [0], [0], [1], [0, 0, 1, 1], [], []>} : vector<32x12xf32>, vector<12x32xf32>, vector<32x32xf32> -> vector<32x32xf32>
    %84 = vector.broadcast %4 : vector<1x32xf32> to vector<32x32xf32>
    %85 = arith.addf %83, %84 : vector<32x32xf32>
    %cst_38 = arith.constant 0.000000e+00 : f32
    %86 = vector.broadcast %cst_38 : f32 to vector<32x32xf32>
    %87 = arith.cmpf ogt, %85, %86 : vector<32x32xf32>
    %cst_39 = arith.constant 2.000000e-01 : f32
    %88 = vector.broadcast %cst_39 : f32 to vector<32x32xf32>
    %89 = arith.mulf %88, %85 : vector<32x32xf32>
    %90 = arith.select %87, %85, %89 : vector<32x32xi1>, vector<32x32xf32>
    %c768 = arith.constant 768 : index
    %c0_40 = arith.constant 0 : index
    %91 = vector.load %arg1[%c768, %c0_40] : memref<840x128xf32, #tpu.memory_space<vmem>>, vector<32x128xf32>
    %cst_41 = arith.constant dense<0.000000e+00> : vector<32x128xf32>
    %92 = tpu.matmul %90, %91, %cst_41 {dimension_numbers = #tpu.dot_dimension_numbers<[1], [0], [0], [1], [0, 0, 1, 1], [], []>} : vector<32x32xf32>, vector<32x128xf32>, vector<32x128xf32> -> vector<32x128xf32>
    %93 = vector.broadcast %5 : vector<1x128xf32> to vector<32x128xf32>
    %94 = arith.addf %92, %93 : vector<32x128xf32>
    %95 = arith.negf %94 : vector<32x128xf32>
    %96 = math.exp %95 : vector<32x128xf32>
    %cst_42 = arith.constant 1.000000e+00 : f32
    %97 = vector.broadcast %cst_42 : f32 to vector<32x128xf32>
    %98 = arith.addf %97, %96 : vector<32x128xf32>
    %99 = arith.divf %97, %98 : vector<32x128xf32>
    %c32_43 = arith.constant 32 : index
    %c0_44 = arith.constant 0 : index
    %100 = vector.load %arg2[%c32_43, %c0_44] : memref<64x128xf32, #tpu.memory_space<vmem>>, vector<32x128xf32>
    tpu.vector_store %arg2[%c32_43, %c0_44], %99 {strides = array<i32>} : memref<64x128xf32, #tpu.memory_space<vmem>>, vector<32x128xf32>,
    return
  }
}

</mosaic_0001>

<bundles_post_ra>
// kernel: graphcdr_core.1
= control target key start
LH: loop header
LB: loop body
LE: loop exit
PB: predicated region body
PF: predicated region fallthrough
CT: control target
= control target key end

     0   :  { %7 = vsyncpa [#allocation3], 0  ;;  %s1782_s9 = smov [#allocation2]   ;;  %s1922_s0 = inlined_call_operand.vmem [shape: f32[64,128], index: 0, kind: input, shape index: {}]   ;;  %s1923_s1 = inlined_call_operand.hbm [shape: f32[840,128], index: 1, kind: input, shape index: {}]   ;;  %s1924_s2 = inlined_call_operand.vmem [shape: f32[64,128], index: 2, kind: output, shape index: {}]  }
   0x1   :  { %s15_s10 = sshll.u32 %s1782_s9, 4  ;;  %s1758_s13 = scalar_lea.hbm %s1923_s1, 13440  ;;  %s16_s10 = int_to_ptr.vmem [resolvable:$true] %s15_s10 }
   0x2   :  { %p1759_p0 = scmp.ne.s32.totalorder %s1923_s1, %s1758_s13  ;;  %p1762_p1 = scmp.lt.u32.totalorder %s1758_s13, %s1923_s1 }
   0x4   :  { %p1764_p2 = pnand %p1762_p1, %p1759_p0 }
   0x6   :  { %1767 = shalt.err (!%p1764_p2)
}
   0x7   :  { %s1768_s18 = scalar_lea.vmem %s16_s10, 13440  ;;  %p1773_p4 = scmp.lt.s32.totalorder %s16_s10, %s16_s10 }
   0x8   :  { %p1769_p3 = scmp.ne.s32.totalorder %s16_s10, %s1768_s18  ;;  %p1774_p5 = scmp.lt.s32.totalorder %s1768_s18, %s1768_s18 }
   0xa   :  { %p1775_p6 = por %p1774_p5, %p1773_p4 }
   0xc   :  { %p1776_p7 = pnand %p1775_p6, %p1769_p3 }
   0xe   :  { %1779 = shalt.err (!%p1776_p7)
}
   0xf   :  { %s1783_s19 = smov 128   ;;  %s1784_s20 = smov 8  }
  0x10   :  { %21 = dma.hbm_to_vmem [thread:$0]  %s1923_s1, 13440, %s16_s10, [#allocation3], %s1783_s19, %s1783_s19, %s1784_s20  }
  0x11   :  { %1780 = dma.done.wait [#allocation3], 13440  }
  0x12   :  { %1781 = vsyncadd [#allocation3], 4294953856  ;;  %v30_v0 = vld [vmem:[#allocation2] sm:$0xff]  ;;  %v31_v1 = vld [vmem:[#allocation2 + $0x8] sm:$0xff]  ;;  %v1785_v28 = vmov 0.0|0.0   ;;  %vm1786_vm0 = vmmov 0   ;;  %v131_v54 = vlaneseq }
  0x13   :  { %v32_v2 = vld [vmem:[#allocation2 + $0x10] sm:$0xff]  ;;  %v1511_v3 = vpack.c.bf16 %v31_v1, %v30_v0  ;;  %v33_v4 = vld [vmem:[#allocation2 + $0x18] sm:$0xff]  ;;  %v34_v6 = vld [vmem:[#allocation2 + $0x20] sm:$0xff]  ;;  %1543 = vmatprep.subr.bf16.mxu1 %v1785_v28  ;;  %v1787_v29 = vmov 0.0   ;;  %vm143_vm2 = vcmask 195584   ;;  %vm321_vm3 = vcmask 1043456  }
  0x14   :  { %v1515_v5 = vpack.c.bf16 %v33_v4, %v32_v2  ;;  %v35_v7 = vld [vmem:[#allocation2 + $0x28] sm:$0xff]  ;;  %v26_v9 = vld [vmem:[%s1922_s0] sm:$0xff]  ;;  %v36_v10 = vld [vmem:[#allocation2 + $0x30] sm:$0xff]  ;;  %1296 = vmatprep.mubr.msk.f32.mxu1 %vm1786_vm0, %v1787_v29  ;;  %v1832_v55 = vshrl.u32 %v131_v54, 7  ;;  %vm1788_vm4 = vmmov 1   ;;  %vm311_vm6 = vcmask 97280  }
  0x15   :  { %1512 = vmatprep.subr.bf16.mxu0 %v1511_v3  ;;  %v1519_v8 = vpack.c.bf16 %v35_v7, %v34_v6  ;;  %v37_v11 = vld [vmem:[#allocation2 + $0x38] sm:$0xff]  ;;  %1284 = vmatprep.mubr.f32.mxu0 %v26_v9  ;;  %v38_v13 = vld [vmem:[#allocation2 + $0x40] sm:$0xff]  ;;  %v39_v14 = vld [vmem:[#allocation2 + $0x48] sm:$0xff]  ;;  %vm449_vm9 = vcmask 1040384   ;;  %vm451_vm10 = vcmask 1041408   ;;  %s1789_s17 = smov 96  }
  0x16   :  { %1514 = vmatpush3.bf16.msra.mxu0 %v1511_v3  ;;  %v1523_v12 = vpack.c.bf16 %v37_v11, %v36_v10  ;;  %v1527_v15 = vpack.c.bf16 %v39_v14, %v38_v13  ;;  %v40_v16 = vld [vmem:[#allocation2 + $0x50] sm:$0xff]  ;;  %v41_v17 = vld [vmem:[#allocation2 + $0x58] sm:$0xff]  ;;  %v42_v19 = vld [vmem:[#allocation2 + $0x60] sm:$0xff]  ;;  %v133_v56 = vsub.s32 0, %v1832_v55  ;;  %v847_v13 = vsub.s32 3, %v1832_v55 }
  0x17   :  { %1516 = vmatprep.subr.bf16.mxu0 %v1515_v5  ;;  %v1531_v18 = vpack.c.bf16 %v41_v17, %v40_v16  ;;  %v43_v20 = vld [vmem:[#allocation2 + $0x68] sm:$0xff]  ;;  %v44_v22 = vld [vmem:[#allocation2 + $0x70] sm:$0xff]  ;;  %v45_v23 = vld [vmem:[#allocation2 + $0x78] sm:$0xff]  ;;  %vm968_vm15 = vcmask 261120  }
  0x18   :  { %v1535_v21 = vpack.c.bf16 %v43_v20, %v42_v19  ;;  %v1539_v24 = vpack.c.bf16 %v45_v23, %v44_v22  ;;  %v27_v25 = vld [vmem:[%s1922_s0 + $0x8] sm:$0xff]  ;;  %v28_v26 = vld [vmem:[%s1922_s0 + $0x10] sm:$0xff]  ;;  %v29_v27 = vld [vmem:[%s1922_s0 + $0x18] sm:$0xff] }
  0x19   :  { %v217_v30 = vld [vmem:[#allocation2 + $0x80] sm:$0xff]  ;;  %v218_v31 = vld [vmem:[#allocation2 + $0x88] sm:$0xff]  ;;  %v219_v32 = vld [vmem:[#allocation2 + $0x90] sm:$0xff] }
  0x1a   :  { %1518 = vmatpush3.bf16.msra.mxu0 %v1515_v5  ;;  %v1546_v33 = vpack.c.bf16 %v218_v31, %v217_v30  ;;  %v220_v34 = vld [vmem:[#allocation2 + $0x98] sm:$0xff]  ;;  %v221_v36 = vld [vmem:[#allocation2 + $0xa0] sm:$0xff]  ;;  %v222_v37 = vld [vmem:[#allocation2 + $0xa8] sm:$0xff] }
  0x1b   :  { %1520 = vmatprep.subr.bf16.mxu0 %v1519_v8  ;;  %v1550_v35 = vpack.c.bf16 %v220_v34, %v219_v32  ;;  %v1554_v38 = vpack.c.bf16 %v222_v37, %v221_v36  ;;  %v223_v39 = vld [vmem:[#allocation2 + $0xb0] sm:$0xff]  ;;  %v224_v40 = vld [vmem:[#allocation2 + $0xb8] sm:$0xff]  ;;  %v225_v42 = vld [vmem:[#allocation2 + $0xc0] sm:$0xff] }
  0x1c   :  { %v1558_v41 = vpack.c.bf16 %v224_v40, %v223_v39  ;;  %v226_v43 = vld [vmem:[#allocation2 + $0xc8] sm:$0xff]  ;;  %v227_v45 = vld [vmem:[#allocation2 + $0xd0] sm:$0xff]  ;;  %v228_v46 = vld [vmem:[#allocation2 + $0xd8] sm:$0xff] }
  0x1d   :  { %v1562_v44 = vpack.c.bf16 %v226_v43, %v225_v42  ;;  %v1566_v47 = vpack.c.bf16 %v228_v46, %v227_v45  ;;  %v229_v48 = vld [vmem:[#allocation2 + $0xe0] sm:$0xff]  ;;  %v230_v49 = vld [vmem:[#allocation2 + $0xe8] sm:$0xff]  ;;  %v231_v51 = vld [vmem:[#allocation2 + $0xf0] sm:$0xff] }
  0x1e   :  { %1522 = vmatpush3.bf16.msra.mxu0 %v1519_v8  ;;  %v1570_v50 = vpack.c.bf16 %v230_v49, %v229_v48  ;;  %v232_v52 = vld [vmem:[#allocation2 + $0xf8] sm:$0xff]  ;;  %v1835_v57 = vld [vmem:[#allocation2 + $0x320] sm:$0xff]  ;;  %v455_v10 = vld [vmem:[#allocation2 + $0x108] sm:$0xff] }
  0x1f   :  { %1524 = vmatprep.subr.bf16.mxu0 %v1523_v12  ;;  %v1574_v53 = vpack.c.bf16 %v232_v52, %v231_v51  ;;  %v134_v58 = vrot.slane %v1835_v57, %v133_v56  ;;  %v142_v6 = vld [vmem:[%s1922_s0 + $0x20] sm:$0xff]  ;;  %vm1846_vm5 = vmpackc.low %vm321_vm3, %vm1788_vm4  ;;  %v456_v16 = vld [vmem:[#allocation2 + $0x110] sm:$0xff] }
  0x20   :  { %v454_v9 = vld [vmem:[#allocation2 + $0x100] sm:$0xff]  ;;  %v457_v17 = vld [vmem:[#allocation2 + $0x118] sm:$0xff]  ;;  %v309_v22 = vld [vmem:[%s1922_s0 + $0x30] sm:$0xff] }
  0x21   :  { %v1582_v14 = vpack.c.bf16 %v455_v10, %v454_v9  ;;  %v1586_v19 = vpack.c.bf16 %v457_v17, %v456_v16  ;;  %v458_v20 = vld [vmem:[#allocation2 + $0x120] sm:$0xff]  ;;  %v463_v30 = vld [vmem:[#allocation2 + $0x148] sm:$0xff]  ;;  %v464_v32 = vld [vmem:[#allocation2 + $0x150] sm:$0xff] }
  0x22   :  { %1526 = vmatpush3.bf16.msra.mxu0 %v1523_v12  ;;  %v468_v37 = vld [vmem:[#allocation2 + $0x170] sm:$0xff]  ;;  %v555_v40 = vld [vmem:[#allocation2 + $0x180] sm:$0xff]  ;;  %v677_v9 = vld [vmem:[#allocation2 + $0x2a8] sm:$0xff] }
  0x23   :  { %1528 = vmatprep.subr.bf16.mxu0 %v1527_v15  ;;  %v557_v43 = vld [vmem:[#allocation2 + $0x190] sm:$0xff]  ;;  %v559_v46 = vld [vmem:[#allocation2 + $0x1a0] sm:$0xff]  ;;  %v681_v16 = vld [vmem:[#allocation2 + $0x2c8] sm:$0xff] }
  0x24   :  { %v561_v49 = vld [vmem:[#allocation2 + $0x1b0] sm:$0xff]  ;;  %v563_v52 = vld [vmem:[#allocation2 + $0x1c0] sm:$0xff] }
  0x25   :  { %v565_v56 = vld [vmem:[#allocation2 + $0x1d0] sm:$0xff] }
  0x26   :  { %1530 = vmatpush3.bf16.msra.mxu0 %v1527_v15 }
  0x27   :  { %1532 = vmatprep.subr.bf16.mxu0 %v1531_v18 }
  0x2a   :  { %1534 = vmatpush3.bf16.msra.mxu0 %v1531_v18  ;;  %v308_v18 = vld [vmem:[%s1922_s0 + $0x28] sm:$0xff] }
  0x2b   :  { %1536 = vmatprep.subr.bf16.mxu0 %v1535_v21 }
  0x2e   :  { %1538 = vmatpush3.bf16.msra.mxu0 %v1535_v21  ;;  %v459_v21 = vld [vmem:[#allocation2 + $0x128] sm:$0xff] }
  0x2f   :  { %1540 = vmatprep.subr.bf16.mxu0 %v1539_v24  ;;  %v1590_v23 = vpack.c.bf16 %v459_v21, %v458_v20  ;;  %v684_v21 = vld [vmem:[#allocation2 + $0x2e0] sm:$0xff] }
  0x32   :  { %1542 = vmatpush3.bf16.msra.mxu0 %v1539_v24  ;;  %v460_v24 = vld [vmem:[#allocation2 + $0x130] sm:$0xff] }
  0x33   :  { %1547 = vmatprep.subr.bf16.mxu0 %v1546_v33 }
  0x35   :  { %1285 = vmatmul.mubr.f32.vlgmr.msra.gmra.mrb[0].mxu0 %v27_v25  ;;  %v461_v25 = vld [vmem:[#allocation2 + $0x138] sm:$0xff] }
  0x36   :  { %1287 = vmatprep.mubr.f32.mxu0 %v28_v26  ;;  %1549 = vmatpush3.bf16.msra.mxu0 %v1546_v33  ;;  %v310_v26 = vld [vmem:[%s1922_s0 + $0x38] sm:$0xff] }
  0x37   :  { %1551 = vmatprep.subr.bf16.mxu0 %v1550_v35  ;;  %v465_v33 = vld [vmem:[#allocation2 + $0x158] sm:$0xff] }
  0x38   :  { %v1602_v34 = vpack.c.bf16 %v465_v33, %v464_v32 }
  0x39   :  { %1288 = vmatmul.mubr.f32.gmra.mrb[2].mxu0 %v29_v27  ;;  %v1594_v27 = vpack.c.bf16 %v461_v25, %v460_v24 }
  0x3a   :  { %1553 = vmatpush3.bf16.msra.mxu0 %v1550_v35  ;;  %v467_v35 = vld [vmem:[#allocation2 + $0x168] sm:$0xff] }
  0x3b   :  { %1555 = vmatprep.subr.bf16.mxu0 %v1554_v38 }
  0x3e   :  { %1557 = vmatpush3.bf16.msra.mxu0 %v1554_v38  ;;  %v469_v38 = vld [vmem:[#allocation2 + $0x178] sm:$0xff] }
  0x3f   :  { %1559 = vmatprep.subr.bf16.mxu0 %v1558_v41  ;;  %v1610_v39 = vpack.c.bf16 %v469_v38, %v468_v37 }
  0x42   :  { %1561 = vmatpush3.bf16.msra.mxu0 %v1558_v41  ;;  %v556_v41 = vld [vmem:[#allocation2 + $0x188] sm:$0xff] }
  0x43   :  { %1563 = vmatprep.subr.bf16.mxu0 %v1562_v44  ;;  %v1614_v42 = vpack.c.bf16 %v556_v41, %v555_v40 }
  0x46   :  { %1565 = vmatpush3.bf16.msra.mxu0 %v1562_v44  ;;  %v558_v44 = vld [vmem:[#allocation2 + $0x198] sm:$0xff] }
  0x47   :  { %1567 = vmatprep.subr.bf16.mxu0 %v1566_v47  ;;  %v1618_v45 = vpack.c.bf16 %v558_v44, %v557_v43 }
  0x4a   :  { %1569 = vmatpush3.bf16.msra.mxu0 %v1566_v47  ;;  %v560_v47 = vld [vmem:[#allocation2 + $0x1a8] sm:$0xff] }
  0x4b   :  { %1571 = vmatprep.subr.bf16.mxu0 %v1570_v50  ;;  %v1622_v48 = vpack.c.bf16 %v560_v47, %v559_v46 }
  0x4e   :  { %1573 = vmatpush3.bf16.msra.mxu0 %v1570_v50  ;;  %v562_v50 = vld [vmem:[#allocation2 + $0x1b8] sm:$0xff] }
  0x4f   :  { %1575 = vmatprep.subr.bf16.mxu0 %v1574_v53  ;;  %v1626_v51 = vpack.c.bf16 %v562_v50, %v561_v49 }
  0x52   :  { %1577 = vmatpush3.bf16.msra.mxu0 %v1574_v53  ;;  %v564_v53 = vld [vmem:[#allocation2 + $0x1c8] sm:$0xff] }
  0x53   :  { %1615 = vmatprep.subr.bf16.mxu0 %v1614_v42  ;;  %v1630_v54 = vpack.c.bf16 %v564_v53, %v563_v52  ;;  %v472_v53 = vsub.s32 1, %v1832_v55 }
 0x108   :  { %v1286_v59 = vpop.f32.mrb[0].mxu0 }
 0x109   :  { %v112_v60 = vpop.f32.mrb[1].mxu0  ;;  %v139_v1 = vmax.f32 %v1286_v59, 0.0 }
 0x10a   :  { %v135_v61 = vadd.f32 %v134_v58, %v112_v60  ;;  %v566_v58 = vld [vmem:[#allocation2 + $0x1d8] sm:$0xff]  ;;  %v567_v60 = vld [vmem:[#allocation2 + $0x1e0] sm:$0xff] }
 0x10b   :  { %v1634_v59 = vpack.c.bf16 %v566_v58, %v565_v56  ;;  %v473_v58 = vrot.slane %v1835_v57, %v472_v53 }
 0x10c   :  { %v137_v62 = vmul.f32 0.2, %v135_v61  ;;  %v1289_v63 = vpop.f32.mrb[2].mxu0  ;;  %vm136_vm1 = vcmp.gt.f32.partialorder %v135_v61, 0.0 }
 0x10d   :  { %v122_v0 = vpop.f32.mrb[3].mxu0  ;;  %v141_v5 = vmax.f32 %v1289_v63, 0.0  ;;  %v569_v63 = vld [vmem:[#allocation2 + $0x1f0] sm:$0xff] }
 0x10e   :  { %v140_v2 = vmax.f32 %v122_v0, 0.0  ;;  %v138_v3 = vsel %vm136_vm1, %v135_v61, %v137_v62  ;;  %v568_v61 = vld [vmem:[#allocation2 + $0x1e8] sm:$0xff]  ;;  %v570_v0 = vld [vmem:[#allocation2 + $0x1f8] sm:$0xff] }
 0x10f   :  { %1331 = vmatprep.mubr.f32.mxu0 %v138_v3  ;;  %v1638_v62 = vpack.c.bf16 %v568_v61, %v567_v60 }
 0x110   :  { %v1544_v4 = vpack.c.bf16 %v140_v2, %v139_v1  ;;  %v1642_v1 = vpack.c.bf16 %v570_v0, %v569_v63  ;;  %v672_v2 = vld [vmem:[#allocation2 + $0x280] sm:$0xff] }
 0x112   :  { %1545 = vmatpush3.bf16.msra.mxu1 %v1544_v4  ;;  %v674_v4 = vld [vmem:[#allocation2 + $0x290] sm:$0xff] }
 0x113   :  { %1294 = vmatprep.subr.mxu1 %v1787_v29 }
 0x116   :  { %1295 = vmatpush3.msra.mxu1 %v141_v5 }
 0x117   :  { %1297 = vmatmul.mubr.msk.f32.vlgmr.msra.gmra.mrb[0].mxu1 %vm143_vm2, %v142_v6  ;;  %1578 = vmatprep.subr.bf16.mxu1 %v1785_v28  ;;  %v462_v28 = vld [vmem:[#allocation2 + $0x140] sm:$0xff]  ;;  %v675_v6 = vld [vmem:[#allocation2 + $0x298] sm:$0xff] }
 0x118   :  { %1338 = vmatprep.mubr.msk.f32.mxu1 %vm1786_vm0, %v1787_v29  ;;  %v1598_v31 = vpack.c.bf16 %v463_v30, %v462_v28 }
 0x1ea   :  { %v213_v7 = vpop.f32.mrb[0].mxu1 }
 0x1eb   :  { %v1298_v8 = vpop.f32.mrb[1].mxu1  ;;  %1332 = vmatmul.mubr.f32.vlgmr.msra.gmra.mrb[4].mxu0 %v213_v7 }
 0x1ec   :  { %1617 = vmatpush3.bf16.msra.mxu0 %v1614_v42  ;;  %v676_v8 = vld [vmem:[#allocation2 + $0x2a0] sm:$0xff] }
 0x1ed   :  { %1619 = vmatprep.subr.bf16.mxu0 %v1618_v45  ;;  %v1654_v10 = vpack.c.bf16 %v677_v9, %v676_v8 }
 0x1f0   :  { %1621 = vmatpush3.bf16.msra.mxu0 %v1618_v45 }
 0x1f1   :  { %1623 = vmatprep.subr.bf16.mxu0 %v1622_v48 }
 0x1f4   :  { %1625 = vmatpush3.bf16.msra.mxu0 %v1622_v48 }
 0x1f5   :  { %1627 = vmatprep.subr.bf16.mxu0 %v1626_v51 }
 0x1f8   :  { %1629 = vmatpush3.bf16.msra.mxu0 %v1626_v51 }
 0x1f9   :  { %1631 = vmatprep.subr.bf16.mxu0 %v1630_v54 }
 0x1fc   :  { %1633 = vmatpush3.bf16.msra.mxu0 %v1630_v54 }
 0x1fd   :  { %1635 = vmatprep.subr.bf16.mxu0 %v1634_v59 }
 0x200   :  { %1637 = vmatpush3.bf16.msra.mxu0 %v1634_v59 }
 0x201   :  { %1639 = vmatprep.subr.bf16.mxu0 %v1638_v62 }
 0x204   :  { %1641 = vmatpush3.bf16.msra.mxu0 %v1638_v62 }
 0x205   :  { %1643 = vmatprep.subr.bf16.mxu0 %v1642_v1 }
 0x208   :  { %1645 = vmatpush3.bf16.msra.mxu0 %v1642_v1 }
 0x2be   :  { %v1333_v11 = vpop.f32.mrb[4].mxu0 }
 0x2bf   :  { %v299_v12 = vpop.f32.mrb[5].mxu0 }
 0x2c0   :  { %v1579_v15 = vpack.c.bf16 %v1333_v11, %v299_v12  ;;  %v678_v11 = vld [vmem:[#allocation2 + $0x2b0] sm:$0xff]  ;;  %v679_v12 = vld [vmem:[#allocation2 + $0x2b8] sm:$0xff] }
 0x2c2   :  { %1581 = vmatpush3.bf16.msk.msra.mxu1 %vm1846_vm5, %v1579_v15  ;;  %v680_v15 = vld [vmem:[#allocation2 + $0x2c0] sm:$0xff] }
 0x2c3   :  { %1583 = vmatprep.subr.bf16.mxu1 %v1582_v14  ;;  %v1662_v17 = vpack.c.bf16 %v681_v16, %v680_v15  ;;  %v656_v16 = vld [vmem:[#allocation2 + $0x200] sm:$0xff] }
 0x2c5   :  { %1339 = vmatmul.mubr.msk.f32.vlgmr.msra.gmra.mrb[2].mxu1 %vm311_vm6, %v308_v18  ;;  %v682_v18 = vld [vmem:[#allocation2 + $0x2d0] sm:$0xff] }
 0x2c6   :  { %1585 = vmatpush3.bf16.msra.mxu1 %v1582_v14  ;;  %1341 = vmatprep.mubr.msk.f32.mxu1 %vm1786_vm0, %v1787_v29  ;;  %v1658_v14 = vpack.c.bf16 %v679_v12, %v678_v11  ;;  %v686_v12 = vld [vmem:[#allocation2 + $0x2f0] sm:$0xff] }
 0x2c7   :  { %1587 = vmatprep.subr.bf16.mxu1 %v1586_v19 }
 0x2c9   :  { %1342 = vmatmul.mubr.msk.f32.gmra.mrb[4].mxu1 %vm311_vm6, %v309_v22  ;;  %v685_v22 = vld [vmem:[#allocation2 + $0x2e8] sm:$0xff] }
 0x2ca   :  { %1589 = vmatpush3.bf16.msra.mxu1 %v1586_v19  ;;  %1344 = vmatprep.mubr.msk.f32.mxu1 %vm1786_vm0, %v1787_v29  ;;  %v466_v29 = vld [vmem:[#allocation2 + $0x160] sm:$0xff]  ;;  %v683_v19 = vld [vmem:[#allocation2 + $0x2d8] sm:$0xff] }
 0x2cb   :  { %1591 = vmatprep.subr.bf16.mxu1 %v1590_v23  ;;  %v1606_v36 = vpack.c.bf16 %v467_v35, %v466_v29  ;;  %v1666_v20 = vpack.c.bf16 %v683_v19, %v682_v18  ;;  %v573_v19 = vsub.s32 2, %v1832_v55 }
 0x2cd   :  { %1345 = vmatmul.mubr.msk.f32.gmra.mrb[6].mxu1 %vm311_vm6, %v310_v26 }
 0x2ce   :  { %1593 = vmatpush3.bf16.msra.mxu1 %v1590_v23  ;;  %1379 = vmatprep.mubr.f32.mxu1 %v138_v3  ;;  %v673_v3 = vld [vmem:[#allocation2 + $0x288] sm:$0xff]  ;;  %v1670_v23 = vpack.c.bf16 %v685_v22, %v684_v21 }
 0x2cf   :  { %1595 = vmatprep.subr.bf16.mxu1 %v1594_v27  ;;  %v1646_v5 = vpack.c.bf16 %v673_v3, %v672_v2 }
 0x2d2   :  { %1597 = vmatpush3.bf16.msra.mxu1 %v1594_v27 }
 0x2d3   :  { %1599 = vmatprep.subr.bf16.mxu1 %v1598_v31 }
 0x2d6   :  { %1601 = vmatpush3.bf16.msra.mxu1 %v1598_v31 }
 0x2d7   :  { %1603 = vmatprep.subr.bf16.mxu1 %v1602_v34 }
 0x2da   :  { %1605 = vmatpush3.bf16.msra.mxu1 %v1602_v34 }
 0x2db   :  { %1607 = vmatprep.subr.bf16.mxu1 %v1606_v36 }
 0x2de   :  { %1609 = vmatpush3.bf16.msra.mxu1 %v1606_v36 }
 0x2df   :  { %1611 = vmatprep.subr.bf16.mxu1 %v1610_v39 }
 0x2e2   :  { %1613 = vmatpush3.bf16.msra.mxu1 %v1610_v39 }
 0x2e3   :  { %1647 = vmatprep.subr.bf16.mxu1 %v1646_v5 }
 0x2e5   :  { %1380 = vmatmul.mubr.f32.vlgmr.msra.gmra.mrb[8].mxu1 %v213_v7  ;;  %v1650_v7 = vpack.c.bf16 %v675_v6, %v674_v4 }
 0x2e6   :  { %1649 = vmatpush3.bf16.msra.mxu1 %v1646_v5 }
 0x2e7   :  { %1651 = vmatprep.subr.bf16.mxu1 %v1650_v7 }
 0x2ea   :  { %1653 = vmatpush3.bf16.msra.mxu1 %v1650_v7 }
 0x2eb   :  { %1655 = vmatprep.subr.bf16.mxu1 %v1654_v10 }
 0x2ee   :  { %1657 = vmatpush3.bf16.msra.mxu1 %v1654_v10 }
 0x2ef   :  { %1659 = vmatprep.subr.bf16.mxu1 %v1658_v14 }
 0x2f2   :  { %1661 = vmatpush3.bf16.msra.mxu1 %v1658_v14  ;;  %v687_v14 = vld [vmem:[#allocation2 + $0x2f8] sm:$0xff] }
 0x2f3   :  { %1663 = vmatprep.subr.bf16.mxu1 %v1662_v17  ;;  %v1674_v15 = vpack.c.bf16 %v687_v14, %v686_v12 }
 0x2f6   :  { %1665 = vmatpush3.bf16.msra.mxu1 %v1662_v17  ;;  %v657_v17 = vld [vmem:[#allocation2 + $0x208] sm:$0xff] }
 0x2f7   :  { %1667 = vmatprep.subr.bf16.mxu1 %v1666_v20  ;;  %v1678_v18 = vpack.c.bf16 %v657_v17, %v656_v16 }
 0x2fa   :  { %1669 = vmatpush3.bf16.msra.mxu1 %v1666_v20  ;;  %v574_v20 = vrot.slane %v1835_v57, %v573_v19 }
 0x2fb   :  { %1671 = vmatprep.subr.bf16.mxu1 %v1670_v23 }
 0x2fe   :  { %1673 = vmatpush3.bf16.msra.mxu1 %v1670_v23 }
 0x2ff   :  { %1675 = vmatprep.subr.bf16.mxu1 %v1674_v15 }
 0x302   :  { %1677 = vmatpush3.bf16.msra.mxu1 %v1674_v15 }
 0x303   :  { %1679 = vmatprep.subr.bf16.mxu1 %v1678_v18 }
 0x398   :  { %v391_v24 = vpop.f32.mrb[2].mxu1 }
 0x399   :  { %v1868_v25 = vmax.f32 %v391_v24, 0.0  ;;  %v1340_v26 = vpop.f32.mrb[3].mxu1 }
 0x39b   :  { %408 = vst [vmem:[%s1924_s2] sm:$0xff] %v1868_v25 }
 0x39c   :  { %v396_v27 = vpop.f32.mrb[4].mxu1 }
 0x39d   :  { %v1874_v28 = vmax.f32 %v396_v27, 0.0  ;;  %v1343_v30 = vpop.f32.mrb[5].mxu1  ;;  %v658_v27 = vld [vmem:[#allocation2 + $0x210] sm:$0xff] }
 0x39e   :  { %v659_v30 = vld [vmem:[#allocation2 + $0x218] sm:$0xff] }
 0x39f   :  { %409 = vst [vmem:[%s1924_s2 + $0x8] sm:$0xff] %v1874_v28  ;;  %v411_v31 = vsel %vm321_vm3, %v1874_v28, 0.0  ;;  %v429_v34 = vrot.slane %v1874_v28, 4 }
 0x3a0   :  { %v412_v32 = vadd.f32 %v411_v31, %v1868_v25  ;;  %v401_v33 = vpop.f32.mrb[6].mxu1 }
 0x3a1   :  { %v407_v29 = vmax.f32 %v401_v33, 0.0  ;;  %v1346_v35 = vpop.f32.mrb[7].mxu1  ;;  %v1682_v33 = vpack.c.bf16 %v659_v30, %v658_v27 }
 0x3a2   :  { %v413_v36 = vrot.slane %v412_v32, 4  ;;  %v661_v35 = vld [vmem:[#allocation2 + $0x228] sm:$0xff] }
 0x3a3   :  { %410 = vst [vmem:[%s1924_s2 + $0x10] sm:$0xff] %v407_v29  ;;  %v430_v37 = vrot.slane %v407_v29, 4  ;;  %v660_v29 = vld [vmem:[#allocation2 + $0x220] sm:$0xff] }
 0x3a4   :  { %v414_v38 = vadd.f32 %v413_v36, %v412_v32  ;;  %v1686_v36 = vpack.c.bf16 %v661_v35, %v660_v29 }
 0x3a5   :  { %v431_v39 = vsel %vm321_vm3, %v429_v34, %v430_v37  ;;  %v434_v40 = vsel %vm321_vm3, %v430_v37, 0.0  ;;  %v662_v37 = vld [vmem:[#allocation2 + $0x230] sm:$0xff] }
 0x3a6   :  { %v415_v41 = vrot.slane %v414_v38, 2  ;;  %v435_v42 = vadd.f32 %v434_v40, %v431_v39  ;;  %v664_v40 = vld [vmem:[#allocation2 + $0x240] sm:$0xff] }
 0x3a8   :  { %v416_v43 = vadd.f32 %v415_v41, %v414_v38  ;;  %v436_v44 = vrot.slane %v435_v42, 4  ;;  %v663_v38 = vld [vmem:[#allocation2 + $0x238] sm:$0xff]  ;;  %v665_v41 = vld [vmem:[#allocation2 + $0x248] sm:$0xff] }
 0x3a9   :  { %v1690_v39 = vpack.c.bf16 %v663_v38, %v662_v37 }
 0x3aa   :  { %v417_v45 = vrot.slane %v416_v43, 1  ;;  %v437_v46 = vadd.f32 %v436_v44, %v435_v42  ;;  %v1694_v42 = vpack.c.bf16 %v665_v41, %v664_v40  ;;  %v667_v44 = vld [vmem:[#allocation2 + $0x258] sm:$0xff] }
 0x3ac   :  { %v418_v47 = vadd.f32 %v417_v45, %v416_v43  ;;  %v438_v48 = vrot.slane %v437_v46, 2  ;;  %v666_v43 = vld [vmem:[#allocation2 + $0x250] sm:$0xff] }
 0x3ad   :  { %v1698_v45 = vpack.c.bf16 %v667_v44, %v666_v43 }
 0x3ae   :  { %v1104_v49 = vmul.f32 -0.083333336, %v418_v47  ;;  %v439_v50 = vadd.f32 %v438_v48, %v437_v46  ;;  %v668_v46 = vld [vmem:[#allocation2 + $0x260] sm:$0xff]  ;;  %v669_v47 = vld [vmem:[#allocation2 + $0x268] sm:$0xff]  ;;  %v670_v48 = vld [vmem:[#allocation2 + $0x270] sm:$0xff] }
 0x3b0   :  { %v422_v51 = vmul.f32 1.442695, %v1104_v49  ;;  %v440_v52 = vrot.slane %v439_v50, 1  ;;  %v671_v49 = vld [vmem:[#allocation2 + $0x278] sm:$0xff] }
 0x3b2   :  { %v441_v54 = vadd.f32 %v440_v52, %v439_v50  ;;  %1734 = vpow2.f32 %v422_v51  ;;  %v1706_v50 = vpack.c.bf16 %v671_v49, %v670_v48  ;;  %v841_v51 = vld [vmem:[#allocation2 + $0x328] sm:$0xff] }
 0x3b4   :  { %v1105_v56 = vmul.f32 -0.083333336, %v441_v54 }
 0x3b6   :  { %v444_v59 = vmul.f32 1.442695, %v1105_v56 }
 0x3b8   :  { %1736 = vpow2.f32 %v444_v59  ;;  %v1381_v60 = vpop.f32.mrb[8].mxu1  ;;  %v843_v59 = vld [vmem:[#allocation2 + $0x338] sm:$0xff] }
 0x3b9   :  { %v546_v61 = vadd.f32 %v1381_v60, %v473_v58  ;;  %v540_v62 = vpop.f32.mrb[9].mxu1  ;;  %v960_v60 = vld [vmem:[#allocation2 + $0x300] sm:$0xff] }
 0x3ba   :  { %v541_v63 = vadd.f32 %v540_v62, %v473_v58  ;;  %v842_v58 = vld [vmem:[#allocation2 + $0x330] sm:$0xff] }
 0x3bb   :  { %v552_v0 = vmul.f32 0.2, %v546_v61  ;;  %vm550_vm7 = vcmp.gt.f32.partialorder %v546_v61, 0.0 }
 0x3bc   :  { %v551_v1 = vmul.f32 0.2, %v541_v63  ;;  %vm549_vm8 = vcmp.gt.f32.partialorder %v541_v63, 0.0  ;;  %v1735_v2 = vpop.eup %1734 }
 0x3bd   :  { %v554_v4 = vsel %vm550_vm7, %v546_v61, %v552_v0  ;;  %v424_v5 = vadd.f32 1.0, %v1735_v2  ;;  %v961_v61 = vld [vmem:[#allocation2 + $0x308] sm:$0xff]  ;;  %v963_v0 = vld [vmem:[#allocation2 + $0x318] sm:$0xff]  ;;  %v848_v2 = vrot.slane %v1835_v57, %v847_v13 }
 0x3be   :  { %v553_v3 = vsel %vm549_vm8, %v541_v63, %v551_v1  ;;  %v1716_v62 = vpack.c.bf16 %v961_v61, %v960_v60  ;;  %v962_v63 = vld [vmem:[#allocation2 + $0x310] sm:$0xff] }
 0x3bf   :  { %1414 = vmatprep.mubr.f32.mxu0 %v553_v3  ;;  %1738 = vrcp.f32 %v424_v5  ;;  %v1720_v1 = vpack.c.bf16 %v963_v0, %v962_v63 }
 0x3c0   :  { %1415 = vmatmul.mubr.f32.vlgmr.msra.gmra.mrb[6].mxu0 %v554_v4 }
 0x3c1   :  { %1491 = vmatprep.mubr.msk.f32.mxu0 %vm311_vm6, %v841_v51 }
 0x3c2   :  { %v1737_v6 = vpop.eup %1736 }
 0x3c3   :  { %v446_v7 = vadd.f32 1.0, %v1737_v6 }
 0x3c5   :  { %1740 = vrcp.f32 %v446_v7 }
 0x3c9   :  { %v1739_v8 = vpop.eup %1738 }
 0x3cf   :  { %v1741_v9 = vpop.eup %1740 }
 0x3d0   :  { %v450_v10 = vsel %vm449_vm9, %v1739_v8, %v1741_v9 }
 0x3d1   :  { %v452_v11 = vsel %vm451_vm10, %v450_v10, 0.0 }
 0x3d2   :  { %453 = vst [vmem:[%s1924_s2 + $0x18] sm:$0xff] %v452_v11 }
 0x493   :  { %v1416_v21 = vpop.f32.mrb[6].mxu0 }
 0x494   :  { %v647_v22 = vadd.f32 %v1416_v21, %v574_v20  ;;  %v641_v23 = vpop.f32.mrb[7].mxu0 }
 0x495   :  { %v642_v24 = vadd.f32 %v641_v23, %v574_v20  ;;  %v966_v20 = vsub.s32 4, %v1832_v55 }
 0x496   :  { %v653_v26 = vmul.f32 0.2, %v647_v22  ;;  %vm651_vm11 = vcmp.gt.f32.partialorder %v647_v22, 0.0 }
 0x497   :  { %v652_v31 = vmul.f32 0.2, %v642_v24  ;;  %vm650_vm12 = vcmp.gt.f32.partialorder %v642_v24, 0.0  ;;  %v967_v21 = vrot.slane %v1835_v57, %v966_v20 }
 0x498   :  { %v655_v34 = vsel %vm651_vm11, %v647_v22, %v653_v26 }
 0x499   :  { %v654_v32 = vsel %vm650_vm12, %v642_v24, %v652_v31 }
 0x49a   :  { %1449 = vmatprep.mubr.f32.mxu1 %v654_v32 }
 0x49b   :  { %1450 = vmatmul.mubr.f32.vlgmr.msra.gmra.mrb[10].mxu1 %v655_v34 }
 0x49c   :  { %1681 = vmatpush3.bf16.msra.mxu1 %v1678_v18  ;;  %1484 = vmatprep.mubr.f32.mxu1 %v1868_v25  ;;  %v1702_v25 = vpack.c.bf16 %v669_v47, %v668_v46 }
 0x49d   :  { %1683 = vmatprep.subr.bf16.mxu1 %v1682_v33 }
 0x4a0   :  { %1685 = vmatpush3.bf16.msra.mxu1 %v1682_v33 }
 0x4a1   :  { %1687 = vmatprep.subr.bf16.mxu1 %v1686_v36 }
 0x4a4   :  { %1689 = vmatpush3.bf16.msra.mxu1 %v1686_v36 }
 0x4a5   :  { %1691 = vmatprep.subr.bf16.mxu1 %v1690_v39 }
 0x4a8   :  { %1693 = vmatpush3.bf16.msra.mxu1 %v1690_v39 }
 0x4a9   :  { %1695 = vmatprep.subr.bf16.mxu1 %v1694_v42 }
 0x4ac   :  { %1697 = vmatpush3.bf16.msra.mxu1 %v1694_v42 }
 0x4ad   :  { %1699 = vmatprep.subr.bf16.mxu1 %v1698_v45 }
 0x4b0   :  { %1701 = vmatpush3.bf16.msra.mxu1 %v1698_v45 }
 0x4b1   :  { %1703 = vmatprep.subr.bf16.mxu1 %v1702_v25 }
 0x4b4   :  { %1705 = vmatpush3.bf16.msra.mxu1 %v1702_v25 }
 0x4b5   :  { %1707 = vmatprep.subr.bf16.mxu1 %v1706_v50 }
 0x4b8   :  { %1709 = vmatpush3.bf16.msra.mxu1 %v1706_v50 }
 0x4bb   :  { %1485 = vmatmul.mubr.f32.vlgmr.msra.gmra.mrb[10].mxu1 %v1874_v28  ;;  %v844_v28 = vld [vmem:[#allocation2 + $0x340] sm:$0xff] }
 0x58e   :  { %v1486_v52 = vpop.f32.mrb[10].mxu1 }
 0x58f   :  { %v829_v53 = vpop.f32.mrb[11].mxu1  ;;  %839 = vrot.lane.b32.xlu0 %v1486_v52, %s1789_s17 }
 0x601   :  { %v840_v54 = vpop.permute.xlu0 %839 }
 0x602   :  { %v1710_v56 = vpack.c.bf16 %v840_v54, %v829_v53 }
 0x604   :  { %1712 = vmatprep.subr.msk.bf16.mxu0 %vm1846_vm5, %v1710_v56 }
 0x605   :  { %1715 = vmatpush3.bf16.msk.msra.mxu0 %vm1846_vm5, %v1710_v56 }
 0x606   :  { %1717 = vmatprep.subr.bf16.mxu0 %v1716_v62 }
 0x608   :  { %1492 = vmatmul.mubr.msk.f32.vlgmr.msra.gmra.mrb[8].mxu0 %vm311_vm6, %v842_v58 }
 0x609   :  { %1494 = vmatprep.mubr.msk.f32.mxu0 %vm311_vm6, %v843_v59  ;;  %1719 = vmatpush3.bf16.msra.mxu0 %v1716_v62 }
 0x60a   :  { %1721 = vmatprep.subr.bf16.mxu0 %v1720_v1 }
 0x60c   :  { %1495 = vmatmul.mubr.msk.f32.gmra.mrb[10].mxu0 %vm311_vm6, %v844_v28 }
 0x60d   :  { %1723 = vmatpush3.bf16.msra.mxu0 %v1720_v1 }
 0x6db   :  { %v1493_v3 = vpop.f32.mrb[8].mxu0 }
 0x6dc   :  { %v935_v4 = vadd.f32 %v1493_v3, %v848_v2  ;;  %v929_v5 = vpop.f32.mrb[9].mxu0 }
 0x6dd   :  { %v930_v6 = vadd.f32 %v929_v5, %v848_v2 }
 0x6de   :  { %v953_v7 = vmul.f32 0.2, %v935_v4  ;;  %vm949_vm13 = vcmp.gt.f32.partialorder %v935_v4, 0.0 }
 0x6df   :  { %vm948_vm14 = vcmp.gt.f32.partialorder %v930_v6, 0.0  ;;  %v952_v8 = vmul.f32 0.2, %v930_v6  ;;  %v1496_v9 = vpop.f32.mrb[10].mxu0 }
 0x6e0   :  { %v945_v10 = vadd.f32 %v1496_v9, %v848_v2  ;;  %v939_v11 = vpop.f32.mrb[11].mxu0  ;;  %v957_v15 = vsel %vm949_vm13, %v935_v4, %v953_v7 }
 0x6e1   :  { %v940_v12 = vadd.f32 %v939_v11, %v848_v2  ;;  %v956_v14 = vsel %vm948_vm14, %v930_v6, %v952_v8 }
 0x6e2   :  { %v955_v16 = vmul.f32 0.2, %v945_v10  ;;  %1505 = vmatprep.mubr.msk.f32.mxu0 %vm968_vm15, %v956_v14  ;;  %vm951_vm0 = vcmp.gt.f32.partialorder %v945_v10, 0.0 }
 0x6e3   :  { %vm950_vm1 = vcmp.gt.f32.partialorder %v940_v12, 0.0  ;;  %v954_v17 = vmul.f32 0.2, %v940_v12  ;;  %1506 = vmatmul.mubr.msk.f32.vlgmr.msra.gmra.mrb[12].mxu0 %vm968_vm15, %v957_v15 }
 0x6e4   :  { %v959_v19 = vsel %vm951_vm0, %v945_v10, %v955_v16 }
 0x6e5   :  { %v958_v18 = vsel %vm950_vm1, %v940_v12, %v954_v17 }
 0x6e6   :  { %1508 = vmatprep.mubr.msk.f32.mxu0 %vm968_vm15, %v958_v18 }
 0x6e7   :  { %1509 = vmatmul.mubr.msk.f32.gmra.mrb[14].mxu0 %vm968_vm15, %v959_v19 }
 0x7b6   :  { %v1507_v22 = vpop.f32.mrb[12].mxu0 }
 0x7b7   :  { %v1053_v23 = vadd.f32 %v1507_v22, %v967_v21  ;;  %v1047_v24 = vpop.f32.mrb[13].mxu0 }
 0x7b8   :  { %v1048_v26 = vadd.f32 %v1047_v24, %v967_v21 }
 0x7b9   :  { %v1116_v27 = vmul.f32 -1.442695, %v1053_v23 }
 0x7ba   :  { %v1115_v30 = vmul.f32 -1.442695, %v1048_v26  ;;  %v1510_v31 = vpop.f32.mrb[14].mxu0 }
 0x7bb   :  { %1742 = vpow2.f32 %v1116_v27  ;;  %v1063_v32 = vadd.f32 %v1510_v31, %v967_v21  ;;  %v1057_v33 = vpop.f32.mrb[15].mxu0 }
 0x7bc   :  { %1744 = vpow2.f32 %v1115_v30  ;;  %v1058_v34 = vadd.f32 %v1057_v33, %v967_v21 }
 0x7bd   :  { %v1118_v29 = vmul.f32 -1.442695, %v1063_v32 }
 0x7be   :  { %v1117_v35 = vmul.f32 -1.442695, %v1058_v34 }
 0x7bf   :  { %1746 = vpow2.f32 %v1118_v29 }
 0x7c0   :  { %1748 = vpow2.f32 %v1117_v35 }
 0x7c5   :  { %v1743_v36 = vpop.eup %1742 }
 0x7c6   :  { %v1745_v55 = vpop.eup %1744  ;;  %v1079_v37 = vadd.f32 1.0, %v1743_v36 }
 0x7c7   :  { %v1078_v57 = vadd.f32 1.0, %v1745_v55 }
 0x7c8   :  { %1750 = vrcp.f32 %v1079_v37 }
 0x7c9   :  { %v1747_v38 = vpop.eup %1746  ;;  %1752 = vrcp.f32 %v1078_v57 }
 0x7ca   :  { %v1749_v39 = vpop.eup %1748  ;;  %v1081_v40 = vadd.f32 1.0, %v1747_v38 }
 0x7cb   :  { %v1080_v41 = vadd.f32 1.0, %v1749_v39 }
 0x7cc   :  { %1754 = vrcp.f32 %v1081_v40 }
 0x7cd   :  { %1756 = vrcp.f32 %v1080_v41 }
 0x7d2   :  { %v1751_v42 = vpop.eup %1750 }
 0x7d3   :  { %v1753_v43 = vpop.eup %1752  ;;  %1091 = vst [vmem:[%s1924_s2 + $0x28] sm:$0xff] %v1751_v42 }
 0x7d4   :  { %1090 = vst [vmem:[%s1924_s2 + $0x20] sm:$0xff] %v1753_v43 }
 0x7d6   :  { %v1755_v44 = vpop.eup %1754 }
 0x7d7   :  { %v1757_v45 = vpop.eup %1756  ;;  %1093 = vst [vmem:[%s1924_s2 + $0x38] sm:$0xff] %v1755_v44 }
 0x7d8   :  { %1092 = vst [vmem:[%s1924_s2 + $0x30] sm:$0xff] %v1757_v45 }
 0x7d9   :  { %1098 = vsyncpa [#allocation3], 1 }

</bundles_post_ra>
